<compile_context>
chip_gen: v6e
topology: v6e:2x2x1
jax: 0.10.0
libtpu: 0.0.40
codegen_flags: <defaults>
</compile_context>

<pallas_src>
import functools

import jax
import jax.numpy as jnp
from jax.experimental import pallas as pl
from jax.experimental.pallas import tpu as pltpu


def _highway_kernel(x_ref, w_ref, b_ref, o_ref, *, num_layers, hidden):
    # x_ref: (TM, H); w_ref: (L, H, 2H); b_ref: (L, 1, 2H); o_ref: (TM, H)
    x = x_ref[...]
    for l in range(num_layers):                       # static unrolled layer loop
        proj = (jnp.dot(x, w_ref[l], preferred_element_type=jnp.float32)
                + b_ref[l])                           # (TM, 2H)
        t = jnp.maximum(proj[:, :hidden], 0.0)        # relu(transform(x))
        g = jax.nn.sigmoid(proj[:, hidden:])          # sigmoid(gate(x))
        x = g * t + (1.0 - g) * x
    o_ref[...] = x.astype(o_ref.dtype)


def highway_encoder_forward(x, w_stack, b_stack):
    """x: (..., H) float32; w_stack: (L, H, 2H); b_stack: (L, 1, 2H)."""
    orig_shape = x.shape
    H = orig_shape[-1]
    L = w_stack.shape[0]

    x2 = x.reshape(-1, H)                             # flatten leading dims
    N = x2.shape[0]

    # Sublane-aligned row tile (multiple of 8), capped at 128 rows per step.
    TM = min(128, ((N + 7) // 8) * 8)
    N_pad = pl.cdiv(N, TM) * TM
    if N_pad != N:
        x2 = jnp.pad(x2, ((0, N_pad - N), (0, 0)))

    grid_spec = pltpu.PrefetchScalarGridSpec(
        num_scalar_prefetch=0,
        grid=(N_pad // TM,),
        in_specs=[
            pl.BlockSpec((TM, H), lambda i: (i, 0)),           # row tile of x
            pl.BlockSpec((L, H, 2 * H), lambda i: (0, 0, 0)),  # packed weights (resident)
            pl.BlockSpec((L, 1, 2 * H), lambda i: (0, 0, 0)),  # packed biases (resident)
        ],
        out_specs=pl.BlockSpec((TM, H), lambda i: (i, 0)),
    )

    out = pl.pallas_call(
        functools.partial(_highway_kernel, num_layers=L, hidden=H),
        out_shape=jax.ShapeDtypeStruct((N_pad, H), x.dtype),
        grid_spec=grid_spec,
        compiler_params=pltpu.CompilerParams(
            dimension_semantics=("parallel",)),       # row tiles are independent
    )(x2, w_stack, b_stack)

    return out[:N].reshape(orig_shape)


def init_params(key, num_layers, hidden):
    """Synthetic params matching nn.Linear init, packed as [transform | gate]."""
    scale = float(hidden) ** -0.5
    keys = jax.random.split(key, 4 * num_layers)
    ws, bs = [], []
    for l in range(num_layers):
        k_wt, k_bt, k_wg, k_bg = keys[4 * l:4 * l + 4]
        # PyTorch nn.Linear weight layout is (out, in); we transpose so the
        # kernel computes x @ W^T + b directly.
        w_t = jax.random.uniform(k_wt, (hidden, hidden), jnp.float32, -scale, scale)
        b_t = jax.random.uniform(k_bt, (hidden,), jnp.float32, -scale, scale)
        w_g = jax.random.uniform(k_wg, (hidden, hidden), jnp.float32, -scale, scale)
        b_g = jax.random.uniform(k_bg, (hidden,), jnp.float32, -scale, scale)
        ws.append(jnp.concatenate([w_t.T, w_g.T], axis=1))   # (H, 2H)
        bs.append(jnp.concatenate([b_t, b_g])[None, :])      # (1, 2H)
    return jnp.stack(ws), jnp.stack(bs)                      # (L,H,2H), (L,1,2H)


def reference_forward(x, w_stack, b_stack):
    """Pure-JAX reference replicating the PyTorch HighwayEncoder.forward."""
    H = x.shape[-1]
    for l in range(w_stack.shape[0]):
        proj = x @ w_stack[l] + b_stack[l, 0]
        t = jnp.maximum(proj[..., :H], 0.0)
        g = jax.nn.sigmoid(proj[..., H:])
        x = g * t + (1.0 - g) * x
    return x


if __name__ == "__main__":
    NUM_LAYERS = 2
    HIDDEN = 128        # lane-aligned hidden size
    BATCH = 2
    SEQ = 16            # batch*seq = 32 rows -> one (32, 128) tile

    key = jax.random.PRNGKey(0)
    k_par, k_x = jax.random.split(key)

    w_stack, b_stack = init_params(k_par, NUM_LAYERS, HIDDEN)
    x = jax.random.normal(k_x, (BATCH, SEQ, HIDDEN), jnp.float32)

    out = highway_encoder_forward(x, w_stack, b_stack)
    jax.block_until_ready(out)

    ref = reference_forward(x, w_stack, b_stack)
    assert out.shape == (BATCH, SEQ, HIDDEN)
    assert jnp.allclose(out, ref, atol=1e-5, rtol=1e-5)

    print("KERNEL_OK")
</pallas_src>

<mosaic_0001>
module attributes {stable_mosaic.version = 11 : i64} {
  func.func @_highway_kernel(%arg0: i32, %arg1: memref<32x128xf32, #tpu.memory_space<vmem>>, %arg2: memref<2x128x256xf32, #tpu.memory_space<vmem>>, %arg3: memref<2x1x256xf32, #tpu.memory_space<vmem>>, %arg4: memref<32x128xf32, #tpu.memory_space<vmem>>) attributes {dimension_semantics = [#tpu.dimension_semantics<parallel>], iteration_bounds = array<i64: 1>, scalar_prefetch = 0 : i64, scratch_operands = 0 : i64, tpu.core_type = #tpu.core_type<tc>, window_params = [{transform_indices = @transform_0, window_bounds = array<i64: 32, 128>}, {pipeline_mode = #tpu.pipeline_mode<synchronous>, transform_indices = @transform_1, window_bounds = array<i64: 2, 128, 256>}, {pipeline_mode = #tpu.pipeline_mode<synchronous>, transform_indices = @transform_2, window_bounds = array<i64: 2, 1, 256>}, {transform_indices = @transform_3, window_bounds = array<i64: 32, 128>}]} {
    %c0 = arith.constant 0 : index
    %c0_0 = arith.constant 0 : index
    %0 = vector.load %arg1[%c0, %c0_0] : memref<32x128xf32, #tpu.memory_space<vmem>>, vector<32x128xf32>
    %c0_1 = arith.constant 0 : index
    %c0_2 = arith.constant 0 : index
    %c0_3 = arith.constant 0 : index
    %1 = vector.load %arg2[%c0_1, %c0_2, %c0_3] : memref<2x128x256xf32, #tpu.memory_space<vmem>>, vector<1x128x256xf32>
    %2 = vector.shape_cast %1 : vector<1x128x256xf32> to vector<128x256xf32>
    %cst = arith.constant dense<0.000000e+00> : vector<32x256xf32>
    %3 = tpu.matmul %0, %2, %cst {dimension_numbers = #tpu.dot_dimension_numbers<[1], [0], [0], [1], [0, 0, 1, 1], [], []>} : vector<32x128xf32>, vector<128x256xf32>, vector<32x256xf32> -> vector<32x256xf32>
    %c0_4 = arith.constant 0 : index
    %c0_5 = arith.constant 0 : index
    %c0_6 = arith.constant 0 : index
    %4 = vector.load %arg3[%c0_4, %c0_5, %c0_6] : memref<2x1x256xf32, #tpu.memory_space<vmem>>, vector<1x1x256xf32>
    %5 = vector.shape_cast %4 : vector<1x1x256xf32> to vector<1x256xf32>
    %6 = vector.broadcast %5 : vector<1x256xf32> to vector<32x256xf32>
    %7 = arith.addf %3, %6 : vector<32x256xf32>
    %8 = vector.extract_strided_slice %7 {offsets = [0, 0], sizes = [32, 128], strides = [1, 1]} : vector<32x256xf32> to vector<32x128xf32>
    %cst_7 = arith.constant 0.000000e+00 : f32
    %9 = vector.broadcast %cst_7 : f32 to vector<32x128xf32>
    %10 = arith.maximumf %8, %9 : vector<32x128xf32>
    %11 = vector.extract_strided_slice %7 {offsets = [0, 128], sizes = [32, 128], strides = [1, 1]} : vector<32x256xf32> to vector<32x128xf32>
    %12 = arith.negf %11 : vector<32x128xf32>
    %13 = math.exp %12 : vector<32x128xf32>
    %cst_8 = arith.constant 1.000000e+00 : f32
    %14 = vector.broadcast %cst_8 : f32 to vector<32x128xf32>
    %15 = arith.addf %14, %13 : vector<32x128xf32>
    %16 = arith.divf %14, %15 : vector<32x128xf32>
    %17 = arith.mulf %16, %10 : vector<32x128xf32>
    %cst_9 = arith.constant 1.000000e+00 : f32
    %18 = vector.broadcast %cst_9 : f32 to vector<32x128xf32>
    %19 = arith.subf %18, %16 : vector<32x128xf32>
    %20 = arith.mulf %19, %0 : vector<32x128xf32>
    %21 = arith.addf %17, %20 : vector<32x128xf32>
    %c1 = arith.constant 1 : index
    %c0_10 = arith.constant 0 : index
    %c0_11 = arith.constant 0 : index
    %22 = vector.load %arg2[%c1, %c0_10, %c0_11] : memref<2x128x256xf32, #tpu.memory_space<vmem>>, vector<1x128x256xf32>
    %23 = vector.shape_cast %22 : vector<1x128x256xf32> to vector<128x256xf32>
    %cst_12 = arith.constant dense<0.000000e+00> : vector<32x256xf32>
    %24 = tpu.matmul %21, %23, %cst_12 {dimension_numbers = #tpu.dot_dimension_numbers<[1], [0], [0], [1], [0, 0, 1, 1], [], []>} : vector<32x128xf32>, vector<128x256xf32>, vector<32x256xf32> -> vector<32x256xf32>
    %c1_13 = arith.constant 1 : index
    %c0_14 = arith.constant 0 : index
    %c0_15 = arith.constant 0 : index
    %25 = vector.load %arg3[%c1_13, %c0_14, %c0_15] : memref<2x1x256xf32, #tpu.memory_space<vmem>>, vector<1x1x256xf32>
    %26 = vector.shape_cast %25 : vector<1x1x256xf32> to vector<1x256xf32>
    %27 = vector.broadcast %26 : vector<1x256xf32> to vector<32x256xf32>
    %28 = arith.addf %24, %27 : vector<32x256xf32>
    %29 = vector.extract_strided_slice %28 {offsets = [0, 0], sizes = [32, 128], strides = [1, 1]} : vector<32x256xf32> to vector<32x128xf32>
    %cst_16 = arith.constant 0.000000e+00 : f32
    %30 = vector.broadcast %cst_16 : f32 to vector<32x128xf32>
    %31 = arith.maximumf %29, %30 : vector<32x128xf32>
    %32 = vector.extract_strided_slice %28 {offsets = [0, 128], sizes = [32, 128], strides = [1, 1]} : vector<32x256xf32> to vector<32x128xf32>
    %33 = arith.negf %32 : vector<32x128xf32>
    %34 = math.exp %33 : vector<32x128xf32>
    %cst_17 = arith.constant 1.000000e+00 : f32
    %35 = vector.broadcast %cst_17 : f32 to vector<32x128xf32>
    %36 = arith.addf %35, %34 : vector<32x128xf32>
    %37 = arith.divf %35, %36 : vector<32x128xf32>
    %38 = arith.mulf %37, %31 : vector<32x128xf32>
    %cst_18 = arith.constant 1.000000e+00 : f32
    %39 = vector.broadcast %cst_18 : f32 to vector<32x128xf32>
    %40 = arith.subf %39, %37 : vector<32x128xf32>
    %41 = arith.mulf %40, %21 : vector<32x128xf32>
    %42 = arith.addf %38, %41 : vector<32x128xf32>
    %c0_19 = arith.constant 0 : index
    %c0_20 = arith.constant 0 : index
    %43 = vector.load %arg4[%c0_19, %c0_20] : memref<32x128xf32, #tpu.memory_space<vmem>>, vector<32x128xf32>
    tpu.vector_store %arg4[%c0_19, %c0_20], %42 {strides = array<i32>} : memref<32x128xf32, #tpu.memory_space<vmem>>, vector<32x128xf32>,
    return
  }
  func.func @transform_0(%arg0: i32) -> (i32, i32) {
    %c0_i32 = arith.constant 0 : i32
    %c0_i32_0 = arith.constant 0 : i32
    return %arg0, %c0_i32 : i32, i32
  }
  func.func @transform_1(%arg0: i32) -> (i32, i32, i32) {
    %c0_i32 = arith.constant 0 : i32
    %c0_i32_0 = arith.constant 0 : i32
    %c0_i32_1 = arith.constant 0 : i32
    %c0_i32_2 = arith.constant 0 : i32
    return %c0_i32, %c0_i32_0, %c0_i32_1 : i32, i32, i32
  }
  func.func @transform_2(%arg0: i32) -> (i32, i32, i32) {
    %c0_i32 = arith.constant 0 : i32
    %c0_i32_0 = arith.constant 0 : i32
    %c0_i32_1 = arith.constant 0 : i32
    %c0_i32_2 = arith.constant 0 : i32
    return %c0_i32, %c0_i32_0, %c0_i32_1 : i32, i32, i32
  }
  func.func @transform_3(%arg0: i32) -> (i32, i32) {
    %c0_i32 = arith.constant 0 : i32
    %c0_i32_0 = arith.constant 0 : i32
    return %arg0, %c0_i32 : i32, i32
  }
}

</mosaic_0001>

<bundles_post_ra>
// kernel: tpu_custom_call.1
= control target key start
LH: loop header
LB: loop body
LE: loop exit
PB: predicated region body
PF: predicated region fallthrough
CT: control target
= control target key end

     0   :  { %8 = vsyncpa [#allocation3], 0  ;;  %s676_s0 = inlined_call_operand.hbm [shape: f32[32,128], index: 0, kind: input, shape index: {}]   ;;  %s677_s1 = inlined_call_operand.hbm [shape: f32[2,128,256], index: 1, kind: input, shape index: {}]   ;;  %s678_s2 = inlined_call_operand.hbm [shape: f32[2,1,256], index: 2, kind: input, shape index: {}]   ;;  %s679_s3 = inlined_call_operand.hbm [shape: f32[32,128], index: 3, kind: output, shape index: {}]  }
   0x1   :  { %9 = vsyncpa [#allocation6], 0 }
   0x2   :  { %10 = vsyncpa [#allocation4], 0  ;;  %s575_s12 = smov [#allocation5]  }
   0x3   :  { %s28_s13 = sshll.u32 %s575_s12, 4  ;;  %s29_s13 = int_to_ptr.vmem [resolvable:$true] %s28_s13 }
   0x4   :  { %s497_s14 = scalar_lea.vmem %s29_s13, 8192  ;;  %p502_p1 = scmp.lt.s32.totalorder %s29_s13, %s29_s13 }
   0x5   :  { %p498_p0 = scmp.ne.s32.totalorder %s29_s13, %s497_s14  ;;  %p503_p2 = scmp.lt.s32.totalorder %s497_s14, %s497_s14 }
   0x7   :  { %p504_p3 = por %p503_p2, %p502_p1 }
   0x9   :  { %p505_p4 = pnand %p504_p3, %p498_p0 }
   0xb   :  { %508 = shalt.err (!%p505_p4)
}
   0xc   :  { %s576_s15 = smov 256   ;;  %s577_s16 = smov 16  }
   0xd   :  { %34 = dma.hbm_to_vmem [thread:$0]  %s677_s1, 8192, %s29_s13, [#allocation6], %s576_s15, %s576_s15, %s577_s16  }
   0xe   :  { %s578_s19 = smov [#allocation2]  }
   0xf   :  { %s16_s20 = sshll.u32 %s578_s19, 4  ;;  %s17_s20 = int_to_ptr.vmem [resolvable:$true] %s16_s20 }
  0x10   :  { %s517_s21 = scalar_lea.vmem %s17_s20, 512  ;;  %p522_p6 = scmp.lt.s32.totalorder %s17_s20, %s17_s20 }
  0x11   :  { %p518_p5 = scmp.ne.s32.totalorder %s17_s20, %s517_s21  ;;  %p523_p7 = scmp.lt.s32.totalorder %s517_s21, %s517_s21 }
  0x13   :  { %p524_p8 = por %p523_p7, %p522_p6 }
  0x15   :  { %p525_p9 = pnand %p524_p8, %p518_p5 }
  0x17   :  { %528 = shalt.err (!%p525_p9)
}
  0x18   :  { %s579_s22 = smov 128   ;;  %s580_s23 = smov 8  }
  0x19   :  { %22 = dma.hbm_to_vmem [thread:$0]  %s676_s0, 512, %s17_s20, [#allocation3], %s579_s22, %s579_s22, %s580_s23  }
  0x1a   :  { %s581_s1 = smov [#allocation7]  }
  0x1b   :  { %s40_s26 = sshll.u32 %s581_s1, 4  ;;  %s41_s26 = int_to_ptr.vmem [resolvable:$true] %s40_s26 }
  0x1c   :  { %s537_s27 = scalar_lea.vmem %s41_s26, 64  ;;  %p542_p11 = scmp.lt.s32.totalorder %s41_s26, %s41_s26 }
  0x1d   :  { %p538_p10 = scmp.ne.s32.totalorder %s41_s26, %s537_s27  ;;  %p543_p12 = scmp.lt.s32.totalorder %s537_s27, %s537_s27 }
  0x1f   :  { %p544_p13 = por %p543_p12, %p542_p11 }
  0x21   :  { %p545_p0 = pnand %p544_p13, %p538_p10 }
  0x23   :  { %548 = shalt.err (!%p545_p0)
}
  0x24   :  { %s582_s28 = smov 32   ;;  %s583_s29 = smov 2  }
  0x25   :  { %46 = dma.hbm_to_vmem [thread:$0]  %s678_s2, 64, %s41_s26, [#allocation6], %s582_s28, %s582_s28, %s583_s29  }
  0x26   :  { %569 = dma.done.wait [#allocation3], 512  }
  0x27   :  { %570 = vsyncadd [#allocation3], 4294966784 }
  0x28   :  { %571 = dma.done.wait [#allocation6], 8256  }
  0x29   :  { %572 = vsyncadd [#allocation6], 4294959040  ;;  %v584_v0 = vmov 0.0   ;;  %v91_v1 = vld [vmem:[#allocation5 + $0xf8] sm:$0xff]  ;;  %v90_v2 = vld [vmem:[#allocation5 + $0xf0] sm:$0xff]  ;;  %s585_s0 = smov [#allocation8]  }
  0x2a   :  { %168 = vmatprep.mubr.f32.mxu0 %v584_v0  ;;  %347 = vmatprep.mubr.f32.mxu1 %v584_v0  ;;  %v89_v3 = vld [vmem:[#allocation5 + $0xe8] sm:$0xff]  ;;  %v88_v4 = vld [vmem:[#allocation5 + $0xe0] sm:$0xff]  ;;  %v87_v5 = vld [vmem:[#allocation5 + $0xd8] sm:$0xff]  ;;  %s425_s2 = sshll.u32 %s585_s0, 4  ;;  %s426_s2 = int_to_ptr.vmem [resolvable:$true] %s425_s2 }
  0x2b   :  { %104 = vmatprep.subr.mxu0 %v91_v1  ;;  %v86_v6 = vld [vmem:[#allocation5 + $0xd0] sm:$0xff]  ;;  %v85_v7 = vld [vmem:[#allocation5 + $0xc8] sm:$0xff]  ;;  %v84_v8 = vld [vmem:[#allocation5 + $0xc0] sm:$0xff]  ;;  %s549_s5 = scalar_lea.vmem %s426_s2, 512  ;;  %p554_p2 = scmp.lt.s32.totalorder %s426_s2, %s426_s2 }
  0x2c   :  { %105 = vmatpush1.msra.mxu0 %v90_v2  ;;  %v83_v9 = vld [vmem:[#allocation5 + $0xb8] sm:$0xff]  ;;  %v82_v10 = vld [vmem:[#allocation5 + $0xb0] sm:$0xff]  ;;  %v81_v11 = vld [vmem:[#allocation5 + $0xa8] sm:$0xff]  ;;  %p550_p1 = scmp.ne.s32.totalorder %s426_s2, %s549_s5  ;;  %p555_p3 = scmp.lt.s32.totalorder %s549_s5, %s549_s5 }
  0x2d   :  { %106 = vmatprep.subr.mxu0 %v89_v3  ;;  %v80_v12 = vld [vmem:[#allocation5 + $0xa0] sm:$0xff]  ;;  %v79_v13 = vld [vmem:[#allocation5 + $0x98] sm:$0xff]  ;;  %v78_v14 = vld [vmem:[#allocation5 + $0x90] sm:$0xff] }
  0x2e   :  { %107 = vmatpush1.msra.mxu0 %v88_v4  ;;  %v77_v15 = vld [vmem:[#allocation5 + $0x88] sm:$0xff]  ;;  %v76_v16 = vld [vmem:[#allocation5 + $0x80] sm:$0xff]  ;;  %v75_v17 = vld [vmem:[#allocation5 + $0x78] sm:$0xff]  ;;  %p556_p4 = por %p555_p3, %p554_p2 }
  0x2f   :  { %108 = vmatprep.subr.mxu0 %v87_v5  ;;  %v74_v18 = vld [vmem:[#allocation5 + $0x70] sm:$0xff]  ;;  %v73_v19 = vld [vmem:[#allocation5 + $0x68] sm:$0xff]  ;;  %v72_v20 = vld [vmem:[#allocation5 + $0x60] sm:$0xff] }
  0x30   :  { %109 = vmatpush1.msra.mxu0 %v86_v6  ;;  %v71_v21 = vld [vmem:[#allocation5 + $0x58] sm:$0xff]  ;;  %v70_v22 = vld [vmem:[#allocation5 + $0x50] sm:$0xff]  ;;  %v69_v23 = vld [vmem:[#allocation5 + $0x48] sm:$0xff]  ;;  %v94_v6 = vlaneseq  ;;  %p557_p5 = pnand %p556_p4, %p550_p1 }
  0x31   :  { %110 = vmatprep.subr.mxu0 %v85_v7  ;;  %v68_v24 = vld [vmem:[#allocation5 + $0x40] sm:$0xff]  ;;  %v67_v25 = vld [vmem:[#allocation5 + $0x38] sm:$0xff]  ;;  %v66_v26 = vld [vmem:[#allocation5 + $0x30] sm:$0xff] }
  0x32   :  { %111 = vmatpush1.msra.mxu0 %v84_v8  ;;  %v65_v27 = vld [vmem:[#allocation5 + $0x28] sm:$0xff]  ;;  %v64_v28 = vld [vmem:[#allocation5 + $0x20] sm:$0xff]  ;;  %v63_v29 = vld [vmem:[#allocation5 + $0x18] sm:$0xff]  ;;  %v635_v7 = vshrl.u32 %v94_v6, 7 }
  0x33   :  { %112 = vmatprep.subr.mxu0 %v83_v9  ;;  %v62_v30 = vld [vmem:[#allocation5 + $0x10] sm:$0xff]  ;;  %v61_v31 = vld [vmem:[#allocation5 + $0x8] sm:$0xff]  ;;  %v60_v32 = vld [vmem:[#allocation5] sm:$0xff] }
  0x34   :  { %113 = vmatpush1.msra.mxu0 %v82_v10  ;;  %v620_v33 = vld [vmem:[#allocation2] sm:$0xff]  ;;  %v624_v34 = vld [vmem:[#allocation2 + $0x8] sm:$0xff]  ;;  %v628_v35 = vld [vmem:[#allocation2 + $0x10] sm:$0xff]  ;;  %v100_v8 = vsub.s32 1, %v635_v7 }
  0x35   :  { %114 = vmatprep.subr.mxu0 %v81_v11  ;;  %v632_v36 = vld [vmem:[#allocation2 + $0x18] sm:$0xff]  ;;  %v268_v38 = vld [vmem:[#allocation5 + $0x1f0] sm:$0xff]  ;;  %v267_v39 = vld [vmem:[#allocation5 + $0x1e8] sm:$0xff] }
  0x36   :  { %115 = vmatpush1.msra.mxu0 %v80_v12  ;;  %v269_v37 = vld [vmem:[#allocation5 + $0x1f8] sm:$0xff]  ;;  %v266_v40 = vld [vmem:[#allocation5 + $0x1e0] sm:$0xff]  ;;  %v264_v42 = vld [vmem:[#allocation5 + $0x1d0] sm:$0xff] }
  0x37   :  { %116 = vmatprep.subr.mxu0 %v79_v13  ;;  %283 = vmatprep.subr.mxu1 %v269_v37  ;;  %v265_v41 = vld [vmem:[#allocation5 + $0x1d8] sm:$0xff]  ;;  %v263_v43 = vld [vmem:[#allocation5 + $0x1c8] sm:$0xff]  ;;  %v262_v44 = vld [vmem:[#allocation5 + $0x1c0] sm:$0xff] }
  0x38   :  { %117 = vmatpush1.msra.mxu0 %v78_v14  ;;  %284 = vmatpush1.msra.mxu1 %v268_v38  ;;  %v261_v45 = vld [vmem:[#allocation5 + $0x1b8] sm:$0xff]  ;;  %v260_v46 = vld [vmem:[#allocation5 + $0x1b0] sm:$0xff]  ;;  %v259_v47 = vld [vmem:[#allocation5 + $0x1a8] sm:$0xff] }
  0x39   :  { %118 = vmatprep.subr.mxu0 %v77_v15  ;;  %285 = vmatprep.subr.mxu1 %v267_v39  ;;  %v258_v48 = vld [vmem:[#allocation5 + $0x1a0] sm:$0xff]  ;;  %v257_v49 = vld [vmem:[#allocation5 + $0x198] sm:$0xff]  ;;  %v256_v50 = vld [vmem:[#allocation5 + $0x190] sm:$0xff] }
  0x3a   :  { %119 = vmatpush1.msra.mxu0 %v76_v16  ;;  %286 = vmatpush1.msra.mxu1 %v266_v40  ;;  %v255_v51 = vld [vmem:[#allocation5 + $0x188] sm:$0xff]  ;;  %v254_v52 = vld [vmem:[#allocation5 + $0x180] sm:$0xff]  ;;  %v253_v53 = vld [vmem:[#allocation5 + $0x178] sm:$0xff] }
  0x3b   :  { %120 = vmatprep.subr.mxu0 %v75_v17  ;;  %287 = vmatprep.subr.mxu1 %v265_v41  ;;  %v252_v54 = vld [vmem:[#allocation5 + $0x170] sm:$0xff]  ;;  %v251_v55 = vld [vmem:[#allocation5 + $0x168] sm:$0xff]  ;;  %v250_v56 = vld [vmem:[#allocation5 + $0x160] sm:$0xff] }
  0x3c   :  { %121 = vmatpush1.msra.mxu0 %v74_v18  ;;  %288 = vmatpush1.msra.mxu1 %v264_v42  ;;  %v249_v57 = vld [vmem:[#allocation5 + $0x158] sm:$0xff]  ;;  %v248_v58 = vld [vmem:[#allocation5 + $0x150] sm:$0xff]  ;;  %v247_v59 = vld [vmem:[#allocation5 + $0x148] sm:$0xff] }
  0x3d   :  { %122 = vmatprep.subr.mxu0 %v73_v19  ;;  %289 = vmatprep.subr.mxu1 %v263_v43  ;;  %v246_v60 = vld [vmem:[#allocation5 + $0x140] sm:$0xff]  ;;  %v245_v61 = vld [vmem:[#allocation5 + $0x138] sm:$0xff]  ;;  %v244_v62 = vld [vmem:[#allocation5 + $0x130] sm:$0xff] }
  0x3e   :  { %123 = vmatpush1.msra.mxu0 %v72_v20  ;;  %290 = vmatpush1.msra.mxu1 %v262_v44  ;;  %v243_v63 = vld [vmem:[#allocation5 + $0x128] sm:$0xff]  ;;  %v242_v1 = vld [vmem:[#allocation5 + $0x120] sm:$0xff]  ;;  %v241_v2 = vld [vmem:[#allocation5 + $0x118] sm:$0xff] }
  0x3f   :  { %124 = vmatprep.subr.mxu0 %v71_v21  ;;  %291 = vmatprep.subr.mxu1 %v261_v45  ;;  %v240_v3 = vld [vmem:[#allocation5 + $0x110] sm:$0xff]  ;;  %v239_v4 = vld [vmem:[#allocation5 + $0x108] sm:$0xff]  ;;  %v238_v5 = vld [vmem:[#allocation5 + $0x100] sm:$0xff] }
  0x40   :  { %125 = vmatpush1.msra.mxu0 %v70_v22  ;;  %292 = vmatpush1.msra.mxu1 %v260_v46  ;;  %v92_v9 = vld [vmem:[#allocation7] sm:$0x3] }
  0x41   :  { %126 = vmatprep.subr.mxu0 %v69_v23  ;;  %293 = vmatprep.subr.mxu1 %v259_v47  ;;  %v101_v10 = vrot.slane %v92_v9, %v100_v8 }
  0x42   :  { %127 = vmatpush1.msra.mxu0 %v68_v24  ;;  %294 = vmatpush1.msra.mxu1 %v258_v48 }
  0x43   :  { %128 = vmatprep.subr.mxu0 %v67_v25  ;;  %295 = vmatprep.subr.mxu1 %v257_v49 }
  0x44   :  { %129 = vmatpush1.msra.mxu0 %v66_v26  ;;  %296 = vmatpush1.msra.mxu1 %v256_v50 }
  0x45   :  { %130 = vmatprep.subr.mxu0 %v65_v27  ;;  %297 = vmatprep.subr.mxu1 %v255_v51 }
  0x46   :  { %131 = vmatpush1.msra.mxu0 %v64_v28  ;;  %298 = vmatpush1.msra.mxu1 %v254_v52 }
  0x47   :  { %132 = vmatprep.subr.mxu0 %v63_v29  ;;  %299 = vmatprep.subr.mxu1 %v253_v53 }
  0x48   :  { %133 = vmatpush1.msra.mxu0 %v62_v30  ;;  %300 = vmatpush1.msra.mxu1 %v252_v54  ;;  %v96_v30 = vsub.s32 0, %v635_v7 }
  0x49   :  { %134 = vmatprep.subr.mxu0 %v61_v31  ;;  %301 = vmatprep.subr.mxu1 %v251_v55 }
  0x4a   :  { %135 = vmatpush1.msra.mxu0 %v60_v32  ;;  %302 = vmatpush1.msra.mxu1 %v250_v56  ;;  %v97_v37 = vrot.slane %v92_v9, %v96_v30 }
  0x4b   :  { %169 = vmatmul.mubr.f32.vlgmr.msra.gmra.mxu0 %v620_v33  ;;  %303 = vmatprep.subr.mxu1 %v249_v57 }
  0x4c   :  { %174 = vmatprep.mubr.f32.mxu0 %v584_v0  ;;  %304 = vmatpush1.msra.mxu1 %v248_v58 }
  0x4d   :  { %305 = vmatprep.subr.mxu1 %v247_v59 }
  0x4e   :  { %306 = vmatpush1.msra.mxu1 %v246_v60 }
  0x4f   :  { %175 = vmatmul.mubr.f32.gmra.mxu0 %v624_v34  ;;  %307 = vmatprep.subr.mxu1 %v245_v61 }
  0x50   :  { %180 = vmatprep.mubr.f32.mxu0 %v584_v0  ;;  %308 = vmatpush1.msra.mxu1 %v244_v62 }
  0x51   :  { %309 = vmatprep.subr.mxu1 %v243_v63 }
  0x52   :  { %310 = vmatpush1.msra.mxu1 %v242_v1 }
  0x53   :  { %181 = vmatmul.mubr.f32.gmra.mxu0 %v628_v35  ;;  %311 = vmatprep.subr.mxu1 %v241_v2 }
  0x54   :  { %186 = vmatprep.mubr.f32.mxu0 %v584_v0  ;;  %312 = vmatpush1.msra.mxu1 %v240_v3 }
  0x55   :  { %313 = vmatprep.subr.mxu1 %v239_v4  ;;  %v271_v4 = vld [vmem:[#allocation7 + $0x2] sm:$0x3] }
  0x56   :  { %314 = vmatpush1.msra.mxu1 %v238_v5 }
  0x57   :  { %187 = vmatmul.mubr.f32.gmra.mxu0 %v632_v36 }
 0x10b   :  { %v170_v11 = vpop.f32.mrf.mxu0 }
 0x10c   :  { %v171_v40 = vadd.f32 %v170_v11, %v97_v37 }
 0x10d   :  { %v172_v12 = vpop.f32.mrf.mxu0 }
 0x10e   :  { %v173_v13 = vadd.f32 %v172_v12, %v101_v10  ;;  %v193_v43 = vmax.f32 %v171_v40, 0.0 }
 0x10f   :  { %v176_v14 = vpop.f32.mrf.mxu0 }
 0x110   :  { %v438_v15 = vmul.f32 -1.442695, %v173_v13  ;;  %v177_v44 = vadd.f32 %v176_v14, %v97_v37 }
 0x111   :  { %v178_v16 = vpop.f32.mrf.mxu0 }
 0x112   :  { %457 = vpow2.f32 %v438_v15  ;;  %v179_v17 = vadd.f32 %v178_v16, %v101_v10  ;;  %v194_v49 = vmax.f32 %v177_v44, 0.0 }
 0x113   :  { %v182_v18 = vpop.f32.mrf.mxu0 }
 0x114   :  { %v439_v19 = vmul.f32 -1.442695, %v179_v17  ;;  %v183_v50 = vadd.f32 %v182_v18, %v97_v37 }
 0x115   :  { %v184_v20 = vpop.f32.mrf.mxu0 }
 0x116   :  { %459 = vpow2.f32 %v439_v19  ;;  %v185_v21 = vadd.f32 %v184_v20, %v101_v10  ;;  %v195_v56 = vmax.f32 %v183_v50, 0.0 }
 0x117   :  { %v188_v22 = vpop.f32.mrf.mxu0 }
 0x118   :  { %v440_v23 = vmul.f32 -1.442695, %v185_v21  ;;  %v189_v57 = vadd.f32 %v188_v22, %v97_v37 }
 0x119   :  { %v190_v24 = vpop.f32.mrf.mxu0 }
 0x11a   :  { %461 = vpow2.f32 %v440_v23  ;;  %v191_v25 = vadd.f32 %v190_v24, %v101_v10  ;;  %v196_v62 = vmax.f32 %v189_v57, 0.0 }
 0x11c   :  { %v441_v26 = vmul.f32 -1.442695, %v191_v25  ;;  %v276_v25 = vrot.slane %v271_v4, %v96_v30 }
 0x11e   :  { %463 = vpow2.f32 %v441_v26 }
 0x11f   :  { %v458_v27 = vpop.eup %457 }
 0x120   :  { %v209_v28 = vadd.f32 1.0, %v458_v27 }
 0x122   :  { %465 = vrcp.f32 %v209_v28 }
 0x123   :  { %v460_v29 = vpop.eup %459 }
 0x124   :  { %v210_v31 = vadd.f32 1.0, %v460_v29 }
 0x126   :  { %467 = vrcp.f32 %v210_v31 }
 0x127   :  { %v462_v32 = vpop.eup %461 }
 0x128   :  { %v211_v38 = vadd.f32 1.0, %v462_v32 }
 0x12a   :  { %469 = vrcp.f32 %v211_v38 }
 0x12b   :  { %v464_v39 = vpop.eup %463 }
 0x12c   :  { %v212_v41 = vadd.f32 1.0, %v464_v39 }
 0x12e   :  { %471 = vrcp.f32 %v212_v41 }
 0x12f   :  { %v466_v42 = vpop.eup %465 }
 0x130   :  { %v225_v45 = vsub.f32 1.0, %v466_v42  ;;  %v221_v46 = vmul.f32 %v466_v42, %v193_v43 }
 0x132   :  { %v229_v47 = vmul.f32 %v225_v45, %v620_v33 }
 0x133   :  { %v468_v48 = vpop.eup %467 }
 0x134   :  { %v644_v51 = vadd.f32 %v229_v47, %v221_v46  ;;  %v226_v52 = vsub.f32 1.0, %v468_v48  ;;  %v222_v53 = vmul.f32 %v468_v48, %v194_v49 }
 0x136   :  { %348 = vmatmul.mubr.f32.vlgmr.msra.gmra.mxu1 %v644_v51  ;;  %v230_v54 = vmul.f32 %v226_v52, %v624_v34 }
 0x137   :  { %v470_v55 = vpop.eup %469  ;;  %353 = vmatprep.mubr.f32.mxu1 %v584_v0 }
 0x138   :  { %v649_v58 = vadd.f32 %v230_v54, %v222_v53  ;;  %v227_v59 = vsub.f32 1.0, %v470_v55  ;;  %v223_v33 = vmul.f32 %v470_v55, %v195_v56 }
 0x13a   :  { %354 = vmatmul.mubr.f32.gmra.mxu1 %v649_v58  ;;  %v231_v60 = vmul.f32 %v227_v59, %v628_v35  ;;  %v280_v35 = vrot.slane %v271_v4, %v100_v8 }
 0x13b   :  { %v472_v61 = vpop.eup %471  ;;  %359 = vmatprep.mubr.f32.mxu1 %v584_v0 }
 0x13c   :  { %v654_v63 = vadd.f32 %v231_v60, %v223_v33  ;;  %v228_v34 = vsub.f32 1.0, %v472_v61  ;;  %v224_v1 = vmul.f32 %v472_v61, %v196_v62 }
 0x13e   :  { %360 = vmatmul.mubr.f32.gmra.mxu1 %v654_v63  ;;  %v232_v2 = vmul.f32 %v228_v34, %v632_v36 }
 0x13f   :  { %365 = vmatprep.mubr.f32.mxu1 %v584_v0 }
 0x140   :  { %v659_v3 = vadd.f32 %v232_v2, %v224_v1 }
 0x142   :  { %366 = vmatmul.mubr.f32.gmra.mxu1 %v659_v3 }
 0x1f6   :  { %v349_v5 = vpop.f32.mrf.mxu1 }
 0x1f7   :  { %v350_v28 = vadd.f32 %v349_v5, %v276_v25 }
 0x1f8   :  { %v351_v6 = vpop.f32.mrf.mxu1 }
 0x1f9   :  { %v352_v9 = vadd.f32 %v351_v6, %v280_v35  ;;  %v372_v32 = vmax.f32 %v350_v28, 0.0 }
 0x1fa   :  { %v355_v10 = vpop.f32.mrf.mxu1 }
 0x1fb   :  { %v442_v11 = vmul.f32 -1.442695, %v352_v9  ;;  %v356_v37 = vadd.f32 %v355_v10, %v276_v25 }
 0x1fc   :  { %v357_v12 = vpop.f32.mrf.mxu1 }
 0x1fd   :  { %473 = vpow2.f32 %v442_v11  ;;  %v358_v13 = vadd.f32 %v357_v12, %v280_v35  ;;  %v373_v42 = vmax.f32 %v356_v37, 0.0 }
 0x1fe   :  { %v361_v14 = vpop.f32.mrf.mxu1 }
 0x1ff   :  { %v443_v36 = vmul.f32 -1.442695, %v358_v13  ;;  %v362_v43 = vadd.f32 %v361_v14, %v276_v25 }
 0x200   :  { %v363_v15 = vpop.f32.mrf.mxu1 }
 0x201   :  { %475 = vpow2.f32 %v443_v36  ;;  %v364_v0 = vadd.f32 %v363_v15, %v280_v35  ;;  %v374_v47 = vmax.f32 %v362_v43, 0.0 }
 0x202   :  { %v367_v16 = vpop.f32.mrf.mxu1 }
 0x203   :  { %v444_v17 = vmul.f32 -1.442695, %v364_v0  ;;  %v368_v48 = vadd.f32 %v367_v16, %v276_v25 }
 0x204   :  { %v369_v18 = vpop.f32.mrf.mxu1 }
 0x205   :  { %477 = vpow2.f32 %v444_v17  ;;  %v370_v19 = vadd.f32 %v369_v18, %v280_v35 }
 0x207   :  { %v445_v20 = vmul.f32 -1.442695, %v370_v19 }
 0x209   :  { %479 = vpow2.f32 %v445_v20 }
 0x20a   :  { %v474_v8 = vpop.eup %473 }
 0x20b   :  { %v388_v21 = vadd.f32 1.0, %v474_v8 }
 0x20d   :  { %481 = vrcp.f32 %v388_v21 }
 0x20e   :  { %v476_v22 = vpop.eup %475 }
 0x20f   :  { %v389_v23 = vadd.f32 1.0, %v476_v22 }
 0x211   :  { %483 = vrcp.f32 %v389_v23 }
 0x212   :  { %v478_v24 = vpop.eup %477 }
 0x213   :  { %v390_v26 = vadd.f32 1.0, %v478_v24 }
 0x215   :  { %485 = vrcp.f32 %v390_v26 }
 0x216   :  { %v480_v27 = vpop.eup %479 }
 0x217   :  { %v391_v29 = vadd.f32 1.0, %v480_v27 }
 0x219   :  { %487 = vrcp.f32 %v391_v29 }
 0x21a   :  { %v482_v31 = vpop.eup %481 }
 0x21b   :  { %v404_v38 = vsub.f32 1.0, %v482_v31  ;;  %v400_v39 = vmul.f32 %v482_v31, %v372_v32 }
 0x21d   :  { %v408_v40 = vmul.f32 %v404_v38, %v644_v51  ;;  %v375_v51 = vmax.f32 %v368_v48, 0.0 }
 0x21e   :  { %v484_v41 = vpop.eup %483 }
 0x21f   :  { %v405_v44 = vsub.f32 1.0, %v484_v41  ;;  %v412_v45 = vadd.f32 %v408_v40, %v400_v39  ;;  %v401_v7 = vmul.f32 %v484_v41, %v373_v42 }
 0x221   :  { %v409_v30 = vmul.f32 %v405_v44, %v649_v58  ;;  %416 = vst [vmem:[#allocation8] sm:$0xff] %v412_v45 }
 0x222   :  { %v486_v46 = vpop.eup %485 }
 0x223   :  { %v406_v49 = vsub.f32 1.0, %v486_v46  ;;  %v413_v50 = vadd.f32 %v409_v30, %v401_v7  ;;  %v402_v52 = vmul.f32 %v486_v46, %v374_v47 }
 0x225   :  { %v410_v53 = vmul.f32 %v406_v49, %v654_v63  ;;  %417 = vst [vmem:[#allocation8 + $0x8] sm:$0xff] %v413_v50 }
 0x226   :  { %v488_v54 = vpop.eup %487 }
 0x227   :  { %v407_v55 = vsub.f32 1.0, %v488_v54  ;;  %v414_v56 = vadd.f32 %v410_v53, %v402_v52  ;;  %v403_v57 = vmul.f32 %v488_v54, %v375_v51 }
 0x229   :  { %v411_v59 = vmul.f32 %v407_v55, %v659_v3  ;;  %418 = vst [vmem:[#allocation8 + $0x10] sm:$0xff] %v414_v56 }
 0x22b   :  { %v415_v58 = vadd.f32 %v411_v59, %v403_v57 }
 0x22d   :  { %419 = vst [vmem:[#allocation8 + $0x18] sm:$0xff] %v415_v58 }
 0x22e   :  { %560 = shalt.err (!%p557_p5)
}
 0x22f   :  { %431 = dma.vmem_to_hbm [thread:$0]  %s426_s2, 512, %s679_s3, [#allocation4], %s579_s22, %s579_s22, %s580_s23  }
 0x230   :  { %573 = dma.done.wait [#allocation4], 512  }
 0x231   :  { %574 = vsyncadd [#allocation4], 4294966784 }
 0x232   :  { %435 = vsyncpa [#allocation3], 1 }
 0x233   :  { %436 = vsyncpa [#allocation6], 1 }
 0x234   :  { %437 = vsyncpa [#allocation4], 1 }

</bundles_post_ra>
